<compile_context>
chip_gen: v7x
topology: tpu7x:2x2x1
jax: 0.10.0
libtpu: 0.0.40
codegen_flags: <defaults>
</compile_context>

<pallas_src>
import jax
import jax.numpy as jnp
import numpy as np
from jax.experimental import pallas as pl
from jax.experimental.pallas import tpu as pltpu


def cbam_kernel(x_ref,      # VMEM (Bt, C, HW) input block
                w1t_ref,    # VMEM (C, Cr)  Linear(C -> Cr) weight, pre-transposed
                b1_ref,     # VMEM (1, Cr)
                w2t_ref,    # VMEM (Cr, C)  Linear(Cr -> C) weight, pre-transposed
                b2_ref,     # VMEM (1, C)
                bmax_ref,   # VMEM (HW, HW) banded 7x7-conv matrix (max channel)
                bavg_ref,   # VMEM (HW, HW) banded 7x7-conv matrix (avg channel)
                o_ref):     # VMEM (Bt, C, HW)
    Bt = x_ref.shape[0]
    x = x_ref[...].astype(jnp.float32)                      # (Bt, C, HW)

    # ---------------- Channel Attention (CAM) ----------------
    q_max = jnp.max(x, axis=2)                              # (Bt, C)  lane reduce
    q_avg = jnp.mean(x, axis=2)                             # (Bt, C)
    pooled = jnp.concatenate([q_max, q_avg], axis=0)        # (2*Bt, C)
    h = jnp.dot(pooled, w1t_ref[...],
                preferred_element_type=jnp.float32) + b1_ref[...]     # (2Bt, Cr)
    h = jnp.maximum(h, 0.0)
    mlp = jnp.dot(h, w2t_ref[...],
                  preferred_element_type=jnp.float32) + b2_ref[...]   # (2Bt, C)
    gate = jax.nn.sigmoid(mlp[:Bt, :] + mlp[Bt:, :])        # lin_max + lin_avg
    y = x * gate[:, :, None]                                # (Bt, C, HW)

    # ---------------- Spatial Attention (SAM) ----------------
    # Channel pooling for all Bt items in one vectorized XLU reduction.
    ch_max = jnp.max(y, axis=1)                             # (Bt, HW)
    ch_avg = jnp.mean(y, axis=1)                            # (Bt, HW)
    # 7x7 "same" conv as a banded matmul on the MXU; the spatial structure and
    # zero padding live entirely in the precomputed band matrices.
    conv = (jnp.dot(ch_max, bmax_ref[...], preferred_element_type=jnp.float32) +
            jnp.dot(ch_avg, bavg_ref[...], preferred_element_type=jnp.float32))
    s = jax.nn.sigmoid(conv)                                # (Bt, HW)
    o_ref[...] = (y * s[:, None, :]).astype(o_ref.dtype)    # unmasked lane-dense vst


def _conv7x7_band_matrices(wconv, H, W):
    """(HW, HW) banded matrices encoding a 7x7 'same' cross-correlation.

    band_c[i, o] = wconv[0, c, ih - oh + 3, iw - ow + 3] whenever the input
    spatial position i = (ih, iw) lies inside the 7x7 window centred on the
    output position o = (oh, ow); zero otherwise (this also encodes the
    zero padding at the image boundary).
    """
    HW = H * W
    pos = np.arange(HW)
    ph, pw = pos // W, pos % W
    dh = ph[:, None] - ph[None, :] + 3                      # static numpy ints
    dw = pw[:, None] - pw[None, :] + 3
    valid = (dh >= 0) & (dh <= 6) & (dw >= 0) & (dw <= 6)   # static numpy bool
    kidx = (np.clip(dh, 0, 6) * 7 + np.clip(dw, 0, 6)).astype(np.int32)
    w = jnp.asarray(wconv, jnp.float32).reshape(2, 49)
    band_max = jnp.where(valid, w[0][kidx], jnp.float32(0))
    band_avg = jnp.where(valid, w[1][kidx], jnp.float32(0))
    return band_max, band_avg


def _vmem_capacity_bytes():
    try:
        cap = getattr(pltpu.get_tpu_info(), "vmem_capacity_bytes", None)
        if cap:
            return int(cap)
    except Exception:
        pass
    return 64 << 20          # conservative fallback: v7x-sized VMEM


def cbam_pallas(x, w1, b1, w2, b2, wconv):
    B, C, H, W = x.shape
    HW = H * W
    Cr = w1.shape[0]

    band_max, band_avg = _conv7x7_band_matrices(wconv, H, W)
    band_bytes = 2 * HW * HW * 4

    # ---- chip-aware Bt / VMEM budget (v7x: 64 MiB, v5e/v6e: 128 MiB) ----
    vmem_cap = _vmem_capacity_bytes()
    budget = max(vmem_cap - (16 << 20), 8 << 20)       # headroom for Mosaic scratch
    per_item = 6 * C * HW * 4    # 2x dbuf in + 2x dbuf out + ~2x f32 temporaries
    bt_cap = max(1, (budget - band_bytes) // per_item)
    if B >= 2:
        bt_cap = min(bt_cap, B // 2)   # >= 2 grid steps: feed both v7x TensorCores
    bt_cap = int(min(bt_cap, 8))
    Bt = 1
    for d in range(1, bt_cap + 1):
        if B % d == 0:
            Bt = d

    block_bytes = Bt * C * HW * 4
    vmem_limit = 6 * block_bytes + band_bytes + (4 << 20)
    vmem_limit = int(min(max(vmem_limit, 16 << 20), vmem_cap - (8 << 20)))

    xf = x.reshape(B, C, HW)                   # lane-dense view (free reshape)
    w1t = jnp.asarray(w1, jnp.float32).T       # (C, Cr)
    w2t = jnp.asarray(w2, jnp.float32).T       # (Cr, C)
    b1r = jnp.asarray(b1, jnp.float32).reshape(1, Cr)
    b2r = jnp.asarray(b2, jnp.float32).reshape(1, C)

    out = pl.pallas_call(
        cbam_kernel,
        out_shape=jax.ShapeDtypeStruct((B, C, HW), x.dtype),
        grid=(B // Bt,),
        in_specs=[
            pl.BlockSpec((Bt, C, HW), lambda g: (g, 0, 0)),
            pl.BlockSpec((C, Cr), lambda g: (0, 0)),
            pl.BlockSpec((1, Cr), lambda g: (0, 0)),
            pl.BlockSpec((Cr, C), lambda g: (0, 0)),
            pl.BlockSpec((1, C), lambda g: (0, 0)),
            pl.BlockSpec((HW, HW), lambda g: (0, 0)),
            pl.BlockSpec((HW, HW), lambda g: (0, 0)),
        ],
        out_specs=pl.BlockSpec((Bt, C, HW), lambda g: (g, 0, 0)),
        compiler_params=pltpu.CompilerParams(
            dimension_semantics=("parallel",),    # batch groups are independent
            vmem_limit_bytes=vmem_limit),
    )(xf, w1t, b1r, w2t, b2r, band_max, band_avg)
    return out.reshape(B, C, H, W)


def cbam_ref(x, w1, b1, w2, b2, wconv):
    """Pure-JAX reference mirroring the PyTorch forward."""
    q_max = jnp.max(x, axis=(2, 3))                         # (B, C)
    q_avg = jnp.mean(x, axis=(2, 3))                        # (B, C)

    def mlp(v):
        h = jnp.maximum(v @ w1.T + b1, 0.0)
        return h @ w2.T + b2

    cw = mlp(q_max) + mlp(q_avg)                            # (B, C)
    y = x * jax.nn.sigmoid(cw)[:, :, None, None]

    ch_max = jnp.max(y, axis=1, keepdims=True)
    ch_avg = jnp.mean(y, axis=1, keepdims=True)
    cat = jnp.concatenate([ch_max, ch_avg], axis=1)         # (B, 2, H, W)
    conv = jax.lax.conv_general_dilated(
        cat, wconv, window_strides=(1, 1), padding=[(3, 3), (3, 3)],
        dimension_numbers=('NCHW', 'OIHW', 'NCHW'))
    return jax.nn.sigmoid(conv) * y


if __name__ == "__main__":
    # Correctness-scale shapes only (perf should be judged on production
    # B/C/H/W with xprof min-of-N, not this launch-overhead-bound case).
    B, C, H, W = 2, 32, 16, 16
    reduction_ratio = 8
    Cr = C // reduction_ratio

    key = jax.random.PRNGKey(0)
    kx, k1, k2, k3, k4, k5 = jax.random.split(key, 6)

    x = jax.random.normal(kx, (B, C, H, W), dtype=jnp.float32)
    w1 = jax.random.normal(k1, (Cr, C), dtype=jnp.float32) * 0.1   # Linear(C -> Cr)
    b1 = jax.random.normal(k2, (Cr,), dtype=jnp.float32) * 0.1
    w2 = jax.random.normal(k3, (C, Cr), dtype=jnp.float32) * 0.1   # Linear(Cr -> C)
    b2 = jax.random.normal(k4, (C,), dtype=jnp.float32) * 0.1
    wconv = jax.random.normal(k5, (1, 2, 7, 7), dtype=jnp.float32) * 0.1  # SAM conv, no bias

    out = jax.block_until_ready(cbam_pallas(x, w1, b1, w2, b2, wconv))
    ref = jax.block_until_ready(cbam_ref(x, w1, b1, w2, b2, wconv))

    np.testing.assert_allclose(np.asarray(out), np.asarray(ref), rtol=1e-3, atol=1e-3)
    print("KERNEL_OK")
</pallas_src>

<mosaic_0001>
module attributes {stable_mosaic.version = 11 : i64} {
  func.func @cbam_kernel(%arg0: i32, %arg1: memref<1x32x256xf32, #tpu.memory_space<vmem>>, %arg2: memref<32x4xf32, #tpu.memory_space<vmem>>, %arg3: memref<1x4xf32, #tpu.memory_space<vmem>>, %arg4: memref<4x32xf32, #tpu.memory_space<vmem>>, %arg5: memref<1x32xf32, #tpu.memory_space<vmem>>, %arg6: memref<256x256xf32, #tpu.memory_space<vmem>>, %arg7: memref<256x256xf32, #tpu.memory_space<vmem>>, %arg8: memref<1x32x256xf32, #tpu.memory_space<vmem>>) attributes {dimension_semantics = [#tpu.dimension_semantics<parallel>], iteration_bounds = array<i64: 2>, scalar_prefetch = 0 : i64, scratch_operands = 0 : i64, tpu.core_type = #tpu.core_type<tc>, window_params = [{transform_indices = @transform_0, window_bounds = array<i64: 1, 32, 256>}, {pipeline_mode = #tpu.pipeline_mode<synchronous>, transform_indices = @transform_1, window_bounds = array<i64: 32, 4>}, {pipeline_mode = #tpu.pipeline_mode<synchronous>, transform_indices = @transform_2, window_bounds = array<i64: 1, 4>}, {pipeline_mode = #tpu.pipeline_mode<synchronous>, transform_indices = @transform_3, window_bounds = array<i64: 4, 32>}, {pipeline_mode = #tpu.pipeline_mode<synchronous>, transform_indices = @transform_4, window_bounds = array<i64: 1, 32>}, {pipeline_mode = #tpu.pipeline_mode<synchronous>, transform_indices = @transform_5, window_bounds = array<i64: 256, 256>}, {pipeline_mode = #tpu.pipeline_mode<synchronous>, transform_indices = @transform_6, window_bounds = array<i64: 256, 256>}, {transform_indices = @transform_7, window_bounds = array<i64: 1, 32, 256>}]} {
    %c0 = arith.constant 0 : index
    %c0_0 = arith.constant 0 : index
    %c0_1 = arith.constant 0 : index
    %0 = vector.load %arg1[%c0, %c0_0, %c0_1] : memref<1x32x256xf32, #tpu.memory_space<vmem>>, vector<1x32x256xf32>
    %cst = arith.constant dense<0xFF800000> : vector<1x32xf32>
    %1 = vector.multi_reduction <maximumf>, %0, %cst [2] : vector<1x32x256xf32> to vector<1x32xf32>
    %cst_2 = arith.constant dense<0.000000e+00> : vector<1x32xf32>
    %2 = vector.multi_reduction <add>, %0, %cst_2 [2] : vector<1x32x256xf32> to vector<1x32xf32>
    %cst_3 = arith.constant 2.560000e+02 : f32
    %3 = vector.broadcast %cst_3 : f32 to vector<1x32xf32>
    %4 = arith.divf %2, %3 : vector<1x32xf32>
    %5 = tpu.concatenate %1, %4 in 0 : vector<1x32xf32>, vector<1x32xf32> -> vector<2x32xf32>
    %c0_4 = arith.constant 0 : index
    %c0_5 = arith.constant 0 : index
    %6 = vector.load %arg2[%c0_4, %c0_5] : memref<32x4xf32, #tpu.memory_space<vmem>>, vector<32x4xf32>
    %cst_6 = arith.constant dense<0.000000e+00> : vector<2x4xf32>
    %7 = tpu.matmul %5, %6, %cst_6 {dimension_numbers = #tpu.dot_dimension_numbers<[1], [0], [0], [1], [0, 0, 1, 1], [], []>} : vector<2x32xf32>, vector<32x4xf32>, vector<2x4xf32> -> vector<2x4xf32>
    %c0_7 = arith.constant 0 : index
    %c0_8 = arith.constant 0 : index
    %8 = vector.load %arg3[%c0_7, %c0_8] : memref<1x4xf32, #tpu.memory_space<vmem>>, vector<1x4xf32>
    %9 = vector.broadcast %8 : vector<1x4xf32> to vector<2x4xf32>
    %10 = arith.addf %7, %9 : vector<2x4xf32>
    %cst_9 = arith.constant 0.000000e+00 : f32
    %11 = vector.broadcast %cst_9 : f32 to vector<2x4xf32>
    %12 = arith.maximumf %10, %11 : vector<2x4xf32>
    %c0_10 = arith.constant 0 : index
    %c0_11 = arith.constant 0 : index
    %13 = vector.load %arg4[%c0_10, %c0_11] : memref<4x32xf32, #tpu.memory_space<vmem>>, vector<4x32xf32>
    %cst_12 = arith.constant dense<0.000000e+00> : vector<2x32xf32>
    %14 = tpu.matmul %12, %13, %cst_12 {dimension_numbers = #tpu.dot_dimension_numbers<[1], [0], [0], [1], [0, 0, 1, 1], [], []>} : vector<2x4xf32>, vector<4x32xf32>, vector<2x32xf32> -> vector<2x32xf32>
    %c0_13 = arith.constant 0 : index
    %c0_14 = arith.constant 0 : index
    %15 = vector.load %arg5[%c0_13, %c0_14] : memref<1x32xf32, #tpu.memory_space<vmem>>, vector<1x32xf32>
    %16 = vector.broadcast %15 : vector<1x32xf32> to vector<2x32xf32>
    %17 = arith.addf %14, %16 : vector<2x32xf32>
    %18 = vector.extract_strided_slice %17 {offsets = [0, 0], sizes = [1, 32], strides = [1, 1]} : vector<2x32xf32> to vector<1x32xf32>
    %19 = vector.extract_strided_slice %17 {offsets = [1, 0], sizes = [1, 32], strides = [1, 1]} : vector<2x32xf32> to vector<1x32xf32>
    %20 = arith.addf %18, %19 : vector<1x32xf32>
    %21 = arith.negf %20 : vector<1x32xf32>
    %22 = math.exp %21 : vector<1x32xf32>
    %cst_15 = arith.constant 1.000000e+00 : f32
    %23 = vector.broadcast %cst_15 : f32 to vector<1x32xf32>
    %24 = arith.addf %23, %22 : vector<1x32xf32>
    %25 = arith.divf %23, %24 : vector<1x32xf32>
    %26 = vector.shape_cast %25 : vector<1x32xf32> to vector<1x32x1xf32>
    %27 = vector.broadcast %26 : vector<1x32x1xf32> to vector<1x32x256xf32>
    %28 = arith.mulf %0, %27 : vector<1x32x256xf32>
    %cst_16 = arith.constant dense<0xFF800000> : vector<1x256xf32>
    %29 = vector.multi_reduction <maximumf>, %28, %cst_16 [1] : vector<1x32x256xf32> to vector<1x256xf32>
    %cst_17 = arith.constant dense<0.000000e+00> : vector<1x256xf32>
    %30 = vector.multi_reduction <add>, %28, %cst_17 [1] : vector<1x32x256xf32> to vector<1x256xf32>
    %cst_18 = arith.constant 3.200000e+01 : f32
    %31 = vector.broadcast %cst_18 : f32 to vector<1x256xf32>
    %32 = arith.divf %30, %31 : vector<1x256xf32>
    %c0_19 = arith.constant 0 : index
    %c0_20 = arith.constant 0 : index
    %33 = vector.load %arg6[%c0_19, %c0_20] : memref<256x256xf32, #tpu.memory_space<vmem>>, vector<256x256xf32>
    %cst_21 = arith.constant dense<0.000000e+00> : vector<1x256xf32>
    %34 = tpu.matmul %29, %33, %cst_21 {dimension_numbers = #tpu.dot_dimension_numbers<[1], [0], [0], [1], [0, 0, 1, 1], [], []>} : vector<1x256xf32>, vector<256x256xf32>, vector<1x256xf32> -> vector<1x256xf32>
    %c0_22 = arith.constant 0 : index
    %c0_23 = arith.constant 0 : index
    %35 = vector.load %arg7[%c0_22, %c0_23] : memref<256x256xf32, #tpu.memory_space<vmem>>, vector<256x256xf32>
    %cst_24 = arith.constant dense<0.000000e+00> : vector<1x256xf32>
    %36 = tpu.matmul %32, %35, %cst_24 {dimension_numbers = #tpu.dot_dimension_numbers<[1], [0], [0], [1], [0, 0, 1, 1], [], []>} : vector<1x256xf32>, vector<256x256xf32>, vector<1x256xf32> -> vector<1x256xf32>
    %37 = arith.addf %34, %36 : vector<1x256xf32>
    %38 = arith.negf %37 : vector<1x256xf32>
    %39 = math.exp %38 : vector<1x256xf32>
    %cst_25 = arith.constant 1.000000e+00 : f32
    %40 = vector.broadcast %cst_25 : f32 to vector<1x256xf32>
    %41 = arith.addf %40, %39 : vector<1x256xf32>
    %42 = arith.divf %40, %41 : vector<1x256xf32>
    %43 = vector.shape_cast %42 : vector<1x256xf32> to vector<1x1x256xf32>
    %44 = vector.broadcast %43 : vector<1x1x256xf32> to vector<1x32x256xf32>
    %45 = arith.mulf %28, %44 : vector<1x32x256xf32>
    %c0_26 = arith.constant 0 : index
    %c0_27 = arith.constant 0 : index
    %c0_28 = arith.constant 0 : index
    %46 = vector.load %arg8[%c0_26, %c0_27, %c0_28] : memref<1x32x256xf32, #tpu.memory_space<vmem>>, vector<1x32x256xf32>
    tpu.vector_store %arg8[%c0_26, %c0_27, %c0_28], %45 {strides = array<i32>} : memref<1x32x256xf32, #tpu.memory_space<vmem>>, vector<1x32x256xf32>,
    return
  }
  func.func @transform_0(%arg0: i32) -> (i32, i32, i32) {
    %c0_i32 = arith.constant 0 : i32
    %c0_i32_0 = arith.constant 0 : i32
    %c0_i32_1 = arith.constant 0 : i32
    return %arg0, %c0_i32, %c0_i32_0 : i32, i32, i32
  }
  func.func @transform_1(%arg0: i32) -> (i32, i32) {
    %c0_i32 = arith.constant 0 : i32
    %c0_i32_0 = arith.constant 0 : i32
    %c0_i32_1 = arith.constant 0 : i32
    return %c0_i32, %c0_i32_0 : i32, i32
  }
  func.func @transform_2(%arg0: i32) -> (i32, i32) {
    %c0_i32 = arith.constant 0 : i32
    %c0_i32_0 = arith.constant 0 : i32
    %c0_i32_1 = arith.constant 0 : i32
    return %c0_i32, %c0_i32_0 : i32, i32
  }
  func.func @transform_3(%arg0: i32) -> (i32, i32) {
    %c0_i32 = arith.constant 0 : i32
    %c0_i32_0 = arith.constant 0 : i32
    %c0_i32_1 = arith.constant 0 : i32
    return %c0_i32, %c0_i32_0 : i32, i32
  }
  func.func @transform_4(%arg0: i32) -> (i32, i32) {
    %c0_i32 = arith.constant 0 : i32
    %c0_i32_0 = arith.constant 0 : i32
    %c0_i32_1 = arith.constant 0 : i32
    return %c0_i32, %c0_i32_0 : i32, i32
  }
  func.func @transform_5(%arg0: i32) -> (i32, i32) {
    %c0_i32 = arith.constant 0 : i32
    %c0_i32_0 = arith.constant 0 : i32
    %c0_i32_1 = arith.constant 0 : i32
    return %c0_i32, %c0_i32_0 : i32, i32
  }
  func.func @transform_6(%arg0: i32) -> (i32, i32) {
    %c0_i32 = arith.constant 0 : i32
    %c0_i32_0 = arith.constant 0 : i32
    %c0_i32_1 = arith.constant 0 : i32
    return %c0_i32, %c0_i32_0 : i32, i32
  }
  func.func @transform_7(%arg0: i32) -> (i32, i32, i32) {
    %c0_i32 = arith.constant 0 : i32
    %c0_i32_0 = arith.constant 0 : i32
    %c0_i32_1 = arith.constant 0 : i32
    return %arg0, %c0_i32, %c0_i32_0 : i32, i32, i32
  }
}

</mosaic_0001>

<bundles_post_ra>
// kernel: tpu_custom_call.1
= control target key start
LH: loop header
LB: loop body
LE: loop exit
PB: predicated region body
PF: predicated region fallthrough
CT: control target
= control target key end

     0   :  { %12 = vsyncpa [#allocation3], 0  ;;  %s1923_s0 = inlined_call_operand.hbm [shape: f32[2,32,256], index: 0, kind: input, shape index: {}]   ;;  %s1924_s1 = inlined_call_operand.vmem [shape: f32[32,4], index: 1, kind: input, shape index: {}]   ;;  %s1925_s2 = inlined_call_operand.vmem [shape: f32[1,4], index: 2, kind: input, shape index: {}]   ;;  %s1926_s3 = inlined_call_operand.vmem [shape: f32[4,32], index: 3, kind: input, shape index: {}]   ;;  %s1927_s4 = inlined_call_operand.vmem [shape: f32[1,32], index: 4, kind: input, shape index: {}]   ;;  %s1928_s5 = inlined_call_operand.hbm [shape: f32[256,256], index: 5, kind: input, shape index: {}]   ;;  %s1929_s6 = inlined_call_operand.hbm [shape: f32[256,256], index: 6, kind: input, shape index: {}]   ;;  %s1930_s7 = inlined_call_operand.hbm [shape: f32[2,32,256], index: 7, kind: output, shape index: {}]  }
   0x1   :  { %14 = vsyncpa [#allocation3 + $0x1], 0 }
   0x2   :  { %15 = vsyncpa [#allocation6], 0 }
   0x3   :  { %16 = vsyncpa [#allocation4], 0 }
   0x4   :  { %18 = vsyncpa [#allocation4 + $0x1], 0  ;;  %s1563_s24 = smov 0   ;;  %s1565_s25 = smov 0  }
   0x5   :  { %s1567_s26 = smov 0   ;;  %s1569_s27 = smov 0  }
   0x6 LB: > { %s1584_s28 = sadd.s32 4294967295, %s1510_s27   ;;  %s1081_s29 = sadd.s32 4294967294, %s1510_s27   ;;  %s1510_s27 = sphi %s1569_s27, %s1952_s27   ;;  %s1506_s26 = sphi %s1567_s26, %s1951_s26   ;;  %s1502_s25 = sphi %s1565_s25, %s1950_s25   ;;  %s1498_s24 = sphi %s1563_s24, %s1949_s24  }
   0x7   : > { %p44_p0 = scmp.ne.s32.totalorder %s1502_s25, %s1498_s24  ;;  %p1931_p1 = scmp.eq.s32.totalorder %s1584_s28, 0 }
   0x8   : > { %p200_p3 = scmp.eq.s32.totalorder %s1081_s29, 1  ;;  %p1082_p5 = scmp.ge.s32.totalorder %s1510_s27, 1 }
   0x9   : > { %p1593_p4 = por %p1931_p1, %p44_p0  ;;  %p207_p7 = scmp.lt.s32.totalorder %s1510_s27, 3 }
   0xa   : > { %p1598_p6 = por %p200_p3, %p44_p0  ;;  %s1512_s10 = smov [#allocation5]  }
   0xb   : > { %s1935_s30 = scalar_select %p1593_p4, 1, 0 }
   0xc   : > { %s1936_s8 = scalar_select %p1598_p6, 1, 0 }
   0xd   : > { %p1603_p8 = pnand %p1082_p5, %p207_p7  ;;  %s231_s11 = sshll.u32 %s1512_s10, 4  ;;  %s1607_s11 = int_to_ptr.vmem [resolvable:$true] %s231_s11 }
   0xe   : > { %s1513_s13 = smov [#allocation7]   ;;  %s1354_s17 = scalar_lea.hbm %s1928_s5, 8192 }
   0xf   : > { %p1280_p9 = pneg %p1603_p8  ;;  %s244_s14 = sshll.u32 %s1513_s13, 4  ;;  %s1618_s14 = int_to_ptr.vmem [resolvable:$true] %s244_s14 }
  0x10   : > { %p1355_p12 = scmp.ne.s32.totalorder %s1928_s5, %s1354_s17  ;;  %p1361_p5 = scmp.lt.u32.totalorder %s1354_s17, %s1928_s5 }
  0x11   : > { %p1614_p11 = pnand %p1280_p9, %p1931_p1 }
  0x13   : > { %p1356_p13 = pneg %p1614_p11 }
  0x15   : > { %p1357_p0 = pnand %p1356_p13, %p1355_p12 }
  0x17   : > { %p1358_p3 = pneg %p1357_p0 }
  0x19   : > { %p1363_p7 = pnand %p1361_p5, %p1358_p3 }
  0x1b   : > { %1366 = shalt.err (!%p1363_p7)
}
  0x1c   : > { %s1367_s22 = scalar_lea.vmem %s1607_s11, 8192  ;;  %p1375_p2 = scmp.lt.s32.totalorder %s1607_s11, %s1607_s11 }
  0x1d   : > { %p1368_p9 = scmp.ne.s32.totalorder %s1607_s11, %s1367_s22  ;;  %p1376_p12 = scmp.lt.s32.totalorder %s1367_s22, %s1367_s22 }
  0x1f   : > { %p1370_p10 = pnand %p1368_p9, %p1356_p13  ;;  %p1377_p0 = por %p1376_p12, %p1375_p2 }
  0x21   : > { %p1371_p1 = pneg %p1370_p10 }
  0x23   : > { %p1378_p6 = pnand %p1377_p0, %p1371_p1 }
  0x25   : > { %1381 = shalt.err (!%p1378_p6)
}
  0x26   : > { %s1932_s23 = smov 256   ;;  %s1515_s29 = smov 16  }
  0x27   : > { %1283 = dma.hbm_to_vmem [thread:$0]  (!%p1614_p11), %s1928_s5, 8192, %s1607_s11, [#allocation6], %s1932_s23, %s1932_s23, %s1515_s29  }
  0x28   : > { %s1382_s17 = scalar_lea.hbm %s1929_s6, 8192 }
  0x29   : > { %p1383_p1 = scmp.ne.s32.totalorder %s1929_s6, %s1382_s17  ;;  %p1389_p10 = scmp.lt.u32.totalorder %s1382_s17, %s1929_s6 }
  0x2b   : > { %p1385_p2 = pnand %p1383_p1, %p1356_p13 }
  0x2d   : > { %p1386_p6 = pneg %p1385_p2 }
  0x2f   : > { %p1391_p3 = pnand %p1389_p10, %p1386_p6 }
  0x31   : > { %1394 = shalt.err (!%p1391_p3)
}
  0x32   : > { %s1395_s11 = scalar_lea.vmem %s1618_s14, 8192  ;;  %p1403_p12 = scmp.lt.s32.totalorder %s1618_s14, %s1618_s14 }
  0x33   : > { %p1396_p5 = scmp.ne.s32.totalorder %s1618_s14, %s1395_s11  ;;  %p1404_p0 = scmp.lt.s32.totalorder %s1395_s11, %s1395_s11 }
  0x35   : > { %p1398_p7 = pnand %p1396_p5, %p1356_p13  ;;  %p1405_p1 = por %p1404_p0, %p1403_p12 }
  0x37   : > { %p1399_p9 = pneg %p1398_p7 }
  0x39   : > { %p1406_p2 = pnand %p1405_p1, %p1399_p9 }
  0x3b   : > { %1409 = shalt.err (!%p1406_p2)
}
  0x3c   : > { %1286 = dma.hbm_to_vmem [thread:$0]  (!%p1614_p11), %s1929_s6, 8192, %s1618_s14, [#allocation6], %s1932_s23, %s1932_s23, %s1515_s29  }
  0x3d   : > { %s1679_s12 = sadd.s32 1, %s1510_s27   ;;  %s31_s13 = sadd.s32 1, %s1506_s26 }
  0x3e   : > { %s28_s15 = ssub.s32 %s1510_s27, %s1679_s12  ;;  %p38_p13 = scmp.ne.s32.totalorder %s1506_s26, %s1502_s25 }
  0x3f   : > { %p29_p6 = scmp.eq.s32.totalorder %s28_s15, 0  ;;  %p39_p10 = scmp.eq.s32.totalorder %s1510_s27, 0 }
  0x40   : > { %p1939_p3 = scmp.eq.s32.totalorder %s1584_s28, 1  ;;  %p1297_p7 = scmp.lt.s32.totalorder %s1510_s27, 2 }
  0x41   : > { %s1695_s17 = scalar_select %p29_p6, %s1506_s26, %s31_s13  }
  0x42   : > { %p1689_p5 = por %p1939_p3, %p38_p13  ;;  %p40_p9 = por %p39_p10, %p38_p13 }
  0x43   : > { %s258_s18 = sand.u32 1, %s1506_s26   ;;  %s1107_s14 = sshll.u32 %s1510_s27, 10 }
  0x44   : > { %s1940_s16 = scalar_select %p1689_p5, 1, 0 }
  0x45   : > { %s1086_s19 = sshll.u32 %s258_s18, 6  ;;  %s1702_s11 = scalar_lea.hbm %s1923_s0, %s1107_s14 }
  0x46   : > { %s262_s22 = scalar_lea.vmem [#allocation2], %s1086_s19  ;;  %p1706_p11 = pnand %p1297_p7, %p40_p9 }
  0x47   : > { %s269_s10 = sshll.u32 %s262_s22, 4  ;;  %s1710_s15 = scalar_lea.sflag [#allocation3], %s258_s18  ;;  %s1704_s10 = int_to_ptr.vmem [resolvable:$true] %s269_s10 }
  0x48   : > { %s1410_s23 = scalar_lea.hbm %s1702_s11, 1024  ;;  %p1412_p0 = pneg %p1706_p11 }
  0x49   : > { %p1411_p12 = scmp.ne.s32.totalorder %s1702_s11, %s1410_s23  ;;  %s1415_s20 = scalar_lea.hbm %s1923_s0, 2048 }
  0x4a   : > { %p1416_p13 = scmp.lt.u32.totalorder %s1702_s11, %s1923_s0  ;;  %p1417_p6 = scmp.lt.u32.totalorder %s1415_s20, %s1410_s23 }
  0x4b   : > { %p1413_p1 = pnand %p1412_p0, %p1411_p12  ;;  %p1419_p3 = scmp.lt.u32.totalorder %s1410_s23, %s1702_s11 }
  0x4c   : > { %p1418_p10 = por %p1417_p6, %p1416_p13 }
  0x4d   : > { %p1414_p2 = pneg %p1413_p1 }
  0x4e   : > { %p1420_p7 = por %p1419_p3, %p1418_p10 }
  0x50   : > { %p1421_p9 = pnand %p1420_p7, %p1414_p2 }
  0x52   : > { %1424 = shalt.err (!%p1421_p9)
}
  0x53   : > { %s1425_s18 = scalar_lea.vmem %s1704_s10, 1024  ;;  %s1516_s19 = smov [#allocation2]  }
  0x54   : > { %p1426_p12 = scmp.ne.s32.totalorder %s1704_s10, %s1425_s18  ;;  %s1430_s14 = sshll.u32 %s1516_s19, 4  ;;  %s1431_s14 = int_to_ptr.vmem [resolvable:$false] %s1430_s14 }
  0x55   : > { %s1432_s21 = scalar_lea.vmem %s1431_s14, 2048  ;;  %p1433_p4 = scmp.lt.s32.totalorder %s1704_s10, %s1431_s14 }
  0x56   : > { %p1428_p1 = pnand %p1426_p12, %p1412_p0  ;;  %p1434_p13 = scmp.lt.s32.totalorder %s1432_s21, %s1425_s18 }
  0x58   : > { %p1429_p5 = pneg %p1428_p1  ;;  %p1435_p6 = por %p1434_p13, %p1433_p4 }
  0x5a   : > { %p1436_p10 = pnand %p1435_p6, %p1429_p5 }
  0x5c   : > { %1439 = shalt.err (!%p1436_p10)
}
  0x5d   : > { %s1942_s23 = smov 256   ;;  %281 = sbr.rel (%p1603_p8) target bundleno = 1133 (0x46d), region = 48 }
  0x5e   : > { %1290 = dma.hbm_to_vmem [thread:$0]  (!%p1706_p11), %s1702_s11, 1024, %s1704_s10, %s1710_s15, %s1942_s23, %s1942_s23, %s1515_s29  }
  0x5f   : > { %s1744_s20 = sand.u32 (!%p1603_p8), 1, %s1502_s25   ;;  %p1943_p4 = scmp.ne.s32.totalorder (!%p1603_p8), %s1935_s30, 0 }
  0x60   : > { %s1090_s22 = sshll.u32 (!%p1603_p8), %s1744_s20, 6  ;;  %s284_s18 = scalar_lea.sflag (!%p1603_p8), [#allocation3], %s1744_s20 }
  0x61   : > { %s287_s13 = scalar_lea.vmem (!%p1603_p8), [#allocation2], %s1090_s22 }
  0x64   : > { %1485 = dma.done.wait (%p1943_p4), %s284_s18, 1024  }
  0x65   : > { %1487 = vsyncadd (%p1943_p4), %s284_s18, 4294966272  ;;  %p1944_p5 = scmp.eq.s32.totalorder %s1584_s28, 0 }
  0x67   : > { %1489 = dma.done.wait (%p1944_p5), [#allocation6], 16384   ;;  %p1945_p8 = pmov %p1944_p5 }
  0x68   : > { %v1758_v0 = vld [vmem:[%s287_s13 + $0x20] sm:$0xff]  ;;  %v1760_v1 = vld [vmem:[%s287_s13 + $0x28] sm:$0xff]  ;;  %v1768_v5 = vld [vmem:[%s287_s13 + $0x10] sm:$0xff]  ;;  %v1517_v19 = vmov 0.0|0.0   ;;  %vm1518_vm0 = vmmov 0   ;;  %v1519_v23 = vmov 0.0   ;;  %v367_v24 = vlaneseq }
  0x69   : > { %1491 = vsyncadd (%p1945_p8), [#allocation6], 4294950912  ;;  %v1762_v2 = vld [vmem:[%s287_s13] sm:$0xff]  ;;  %v352_v3 = vadd.f32 %v1760_v1, %v1758_v0  ;;  %v1766_v4 = vld [vmem:[%s287_s13 + $0x8] sm:$0xff]  ;;  %v340_v15 = vmax.f32 %v1758_v0, %v1760_v1  ;;  %1132 = vmatprep.subr.bf16.mxu0 %v1517_v19  ;;  %1124 = vmatprep.mubr.msk.f32.mxu0 %vm1518_vm0, %v1519_v23  ;;  %vm378_vm1 = vcmask 130112   ;;  %vm385_vm2 = vcmask 195712  }
  0x6a   : > { %v1770_v6 = vld [vmem:[%s287_s13 + $0x18] sm:$0xff]  ;;  %v346_v7 = vadd.f32 %v1766_v4, %v1762_v2  ;;  %v334_v8 = vmax.f32 %v1762_v2, %v1766_v4  ;;  %v1778_v10 = vld [vmem:[%s287_s13 + $0x30] sm:$0xff]  ;;  %v421_v16 = vld [vmem:[%s1924_s1] sm:$0xff]  ;;  %1127 = vmatprep.subr.mxu1 %v1519_v23  ;;  %1129 = vmatprep.mubr.msk.f32.mxu1 %vm1518_vm0, %v1519_v23  ;;  %v368_v25 = vand.u32 127, %v367_v24  ;;  %v1802_v29 = vshrl.u32 %v367_v24, 7  ;;  %s1108_s29 = sshll.u32 %s1584_s28, 10 }
  0x6b   : > { %353 = vadd.xlane.f32.xlu1 %v352_v3  ;;  %v349_v9 = vadd.f32 %v1770_v6, %v1768_v5  ;;  %v1780_v11 = vld [vmem:[%s287_s13 + $0x38] sm:$0xff]  ;;  %v337_v13 = vmax.f32 %v1768_v5, %v1770_v6  ;;  %v422_v17 = vld [vmem:[%s1924_s1 + $0x8] sm:$0xff]  ;;  %v423_v20 = vld [vmem:[%s1924_s1 + $0x10] sm:$0xff]  ;;  %vm392_vm3 = vcmask 261312   ;;  %vm419_vm4 = vcmask 1040384   ;;  %s325_s11 = scalar_lea.vmem [#allocation8], %s1090_s22  ;;  %s1873_s28 = scalar_lea.hbm %s1930_s7, %s1108_s29 }
  0x6c   : > { %347 = vadd.xlane.f32.xlu0 %v346_v7  ;;  %v355_v12 = vadd.f32 %v1780_v11, %v1778_v10  ;;  %v343_v14 = vmax.f32 %v1778_v10, %v1780_v11  ;;  %v1133_v18 = vpack.c.bf16 %v422_v17, %v421_v16  ;;  %v424_v21 = vld [vmem:[%s1924_s1 + $0x18] sm:$0xff]  ;;  %v373_v28 = vadd.s32 4294967288, %v368_v25  ;;  %v507_v61 = vld [vmem:[%s1926_s3] sm:$0xf]  ;;  %v735_v17 = vld [vmem:[#allocation7 + $0x10] sm:$0xff]  ;;  %s989_s10 = sshll.u32 %s325_s11, 4  ;;  %s1875_s10 = int_to_ptr.vmem [resolvable:$true] %s989_s10 }
  0x6d   : > { %v1136_v22 = vpack.c.bf16 %v424_v21, %v423_v20  ;;  %v387_v33 = vadd.s32 4294967272, %v368_v25  ;;  %v380_v34 = vadd.s32 4294967280, %v368_v25  ;;  %v371_v36 = vsub.s32 %v368_v25, %v1802_v29  ;;  %v1094_v62 = vld [vmem:[%s1925_s2] ss:$0 sm:$0xff]  ;;  %v671_v21 = vld [vmem:[#allocation5 + $0x10] sm:$0xff]  ;;  %v740_v24 = vld [vmem:[#allocation7 + $0x38] sm:$0xff] }
  0x6e   : > { %1134 = vmatpush3.bf16.msra.mxu0 %v1133_v18  ;;  %v376_v31 = vsub.s32 %v373_v28, %v1802_v29  ;;  %vm432_vm5 = vcmask 261120   ;;  %vm519_vm6 = vcmask 1043456   ;;  %vm515_vm7 = vcmask 31744   ;;  %v733_v16 = vld [vmem:[#allocation7] sm:$0xff]  ;;  %v674_v25 = vld [vmem:[#allocation5 + $0x28] sm:$0xff]  ;;  %s976_s22 = scalar_lea.sflag [#allocation4], %s1744_s20 }
  0x6f   : > { %335 = vmax.xlane.f32.xlu1 %v334_v8  ;;  %1135 = vmatprep.subr.bf16.mxu0 %v1517_v19  ;;  %v390_v41 = vsub.s32 %v387_v33, %v1802_v29  ;;  %v383_v43 = vsub.s32 %v380_v34, %v1802_v29  ;;  %v1140_v19 = vpack.c.bf16 %v735_v17, %v733_v16  ;;  %v669_v20 = vld [vmem:[#allocation5] sm:$0xff]  ;;  %v675_v34 = vld [vmem:[#allocation5 + $0x30] sm:$0xff]  ;;  %v690_v16 = vld [vmem:[#allocation5 + $0xa8] sm:$0xff]  ;;  %s1440_s14 = scalar_lea.vmem %s1875_s10, 1024  ;;  %p1946_p0 = scmp.ne.s32.totalorder %s1940_s16, 0 }
  0x70   : > { %350 = vadd.xlane.f32.xlu0 %v349_v9  ;;  %1128 = vmatpush3.msk.msra.mxu1 %vm519_vm6, %v507_v61  ;;  %v734_v9 = vld [vmem:[#allocation7 + $0x8] sm:$0xff]  ;;  %v1204_v23 = vpack.c.bf16 %v671_v21, %v669_v20  ;;  %v688_v61 = vld [vmem:[#allocation5 + $0x98] sm:$0xff]  ;;  %v753_v21 = vld [vmem:[#allocation7 + $0xa0] sm:$0xff]  ;;  %p1441_p11 = scmp.ne.s32.totalorder %s1875_s10, %s1440_s14  ;;  %s1520_s21 = smov [#allocation8]  }
  0x71   : > { %v692_v17 = vld [vmem:[#allocation5 + $0xb8] sm:$0xff]  ;;  %s1444_s23 = sshll.u32 %s1520_s21, 4  ;;  %s1445_s23 = int_to_ptr.vmem [resolvable:$false] %s1444_s23 }
  0x72   : > { %1137 = vmatpush3.bf16.msra.mxu0 %v1136_v22  ;;  %v738_v22 = vld [vmem:[#allocation7 + $0x28] sm:$0xff]  ;;  %p1442_p2 = pnand %p1441_p11, %p1946_p0  ;;  %s1446_s18 = scalar_lea.vmem %s1445_s23, 2048 }
  0x73   : > { %356 = vadd.xlane.f32.xlu1 %v355_v12  ;;  %v736_v12 = vld [vmem:[#allocation7 + $0x18] sm:$0xff]  ;;  %p1447_p7 = scmp.lt.s32.totalorder %s1875_s10, %s1445_s23  ;;  %p1448_p9 = scmp.lt.s32.totalorder %s1446_s18, %s1440_s14 }
  0x74   : > { %338 = vmax.xlane.f32.xlu0 %v337_v13  ;;  %v670_v13 = vld [vmem:[#allocation5 + $0x8] sm:$0xff]  ;;  %p1443_p3 = pneg %p1442_p2 }
  0x75   : > { %p1449_p12 = por %p1448_p9, %p1447_p7 }
  0x77   : > { %344 = vmax.xlane.f32.xlu1 %v343_v14  ;;  %v1138_v14 = vpack.c.bf16 %v736_v12, %v734_v9  ;;  %v685_v9 = vld [vmem:[#allocation5 + $0x80] sm:$0xff]  ;;  %p1450_p1 = pnand %p1449_p12, %p1443_p3 }
  0x78   : > { %341 = vmax.xlane.f32.xlu0 %v340_v15  ;;  %v672_v15 = vld [vmem:[#allocation5 + $0x18] sm:$0xff] }
  0x79   : > { %v1202_v18 = vpack.c.bf16 %v672_v15, %v670_v13  ;;  %1139 = vmatprep.subr.bf16.mxu0 %v1138_v14  ;;  %v687_v13 = vld [vmem:[#allocation5 + $0x90] sm:$0xff]  ;;  %v754_v14 = vld [vmem:[#allocation7 + $0xa8] sm:$0xff]  ;;  %v756_v15 = vld [vmem:[#allocation7 + $0xb8] sm:$0xff] }
  0x7a   : > { %v1158_v20 = vpack.c.bf16 %v756_v15, %v754_v14  ;;  %v1096_v15 = vld [vmem:[%s1927_s4] ss:$0 sm:$0xff] }
  0x7b   : > { %1203 = vmatprep.subr.bf16.mxu1 %v1202_v18 }
  0xf8   : > { %v354_v26 = vpop.xlane.xlu1 %353 }
  0xf9   : > { %v348_v27 = vpop.xlane.xlu0 %347  ;;  %v361_v44 = vmul.f32 0.00390625, %v354_v26  ;;  %v676_v26 = vld [vmem:[#allocation5 + $0x38] sm:$0xff] }
  0xfa   : > { %v359_v37 = vmul.f32 0.00390625, %v348_v27  ;;  %v1142_v27 = vpack.c.bf16 %v740_v24, %v738_v22  ;;  %v1206_v28 = vpack.c.bf16 %v676_v26, %v674_v25  ;;  %v755_v22 = vld [vmem:[#allocation7 + $0xb0] sm:$0xff]  ;;  %v1222_v24 = vpack.c.bf16 %v692_v17, %v690_v16  ;;  %v758_v26 = vld [vmem:[#allocation7 + $0xc8] sm:$0xff] }
  0xfb   : > { %v411_v53 = vrot.slane %v361_v44, %v383_v43  ;;  %v677_v44 = vld [vmem:[#allocation5 + $0x40] sm:$0xff]  ;;  %v691_v25 = vld [vmem:[#allocation5 + $0xb0] sm:$0xff] }
  0xfc   : > { %v336_v30 = vpop.xlane.xlu1 %335  ;;  %v402_v45 = vrot.slane %v359_v37, %v371_v36 }
  0xfd   : > { %v351_v32 = vpop.xlane.xlu0 %350  ;;  %v372_v49 = vrot.slane %v336_v30, %v371_v36  ;;  %v737_v30 = vld [vmem:[#allocation7 + $0x20] sm:$0xff]  ;;  %v744_v36 = vld [vmem:[#allocation7 + $0x58] sm:$0xff] }
  0xfe   : > { %v360_v35 = vmul.f32 0.00390625, %v351_v32  ;;  %v673_v32 = vld [vmem:[#allocation5 + $0x20] sm:$0xff] }
  0xff   : > { %v1208_v37 = vpack.c.bf16 %v675_v34, %v673_v32  ;;  %v757_v34 = vld [vmem:[#allocation7 + $0xc0] sm:$0xff] }
 0x100   : > { %v357_v38 = vpop.xlane.xlu1 %356  ;;  %v406_v39 = vrot.slane %v360_v35, %v376_v31  ;;  %v742_v35 = vld [vmem:[#allocation7 + $0x48] sm:$0xff] }
 0x101   : > { %v339_v40 = vpop.xlane.xlu0 %338  ;;  %v362_v42 = vmul.f32 0.00390625, %v357_v38  ;;  %v1146_v38 = vpack.c.bf16 %v744_v36, %v742_v35  ;;  %v759_v35 = vld [vmem:[#allocation7 + $0xd0] sm:$0xff]  ;;  %v693_v36 = vld [vmem:[#allocation5 + $0xc0] sm:$0xff] }
 0x102   : > { %v377_v46 = vrot.slane %v339_v40, %v376_v31  ;;  %v407_v48 = vsel %vm378_vm1, %v406_v39, %v402_v45  ;;  %v739_v31 = vld [vmem:[#allocation7 + $0x30] sm:$0xff]  ;;  %v678_v39 = vld [vmem:[#allocation5 + $0x48] sm:$0xff]  ;;  %v680_v40 = vld [vmem:[#allocation5 + $0x58] sm:$0xff] }
 0x103   : > { %v416_v50 = vrot.slane %v362_v42, %v390_v41  ;;  %v412_v57 = vsel %vm385_vm2, %v411_v53, %v407_v48  ;;  %v1144_v33 = vpack.c.bf16 %v739_v31, %v737_v30  ;;  %v1210_v42 = vpack.c.bf16 %v680_v40, %v678_v39  ;;  %v679_v45 = vld [vmem:[#allocation5 + $0x50] sm:$0xff]  ;;  %v748_v48 = vld [vmem:[#allocation7 + $0x78] sm:$0xff]  ;;  %v745_v53 = vld [vmem:[#allocation7 + $0x60] sm:$0xff] }
 0x104   : > { %v345_v47 = vpop.xlane.xlu1 %344  ;;  %v379_v55 = vsel %vm378_vm1, %v377_v46, %v372_v49  ;;  %v682_v49 = vld [vmem:[#allocation5 + $0x68] sm:$0xff]  ;;  %v696_v30 = vld [vmem:[#allocation5 + $0xd8] sm:$0xff]  ;;  %v1160_v31 = vpack.c.bf16 %v755_v22, %v753_v21 }
 0x105   : > { %v342_v51 = vpop.xlane.xlu0 %341  ;;  %v391_v52 = vrot.slane %v345_v47, %v390_v41  ;;  %v417_v59 = vsel %vm392_vm3, %v416_v50, %v412_v57  ;;  %v741_v41 = vld [vmem:[#allocation7 + $0x40] sm:$0xff]  ;;  %v746_v47 = vld [vmem:[#allocation7 + $0x68] sm:$0xff]  ;;  %v1212_v50 = vpack.c.bf16 %v679_v45, %v677_v44  ;;  %v683_v57 = vld [vmem:[#allocation5 + $0x70] sm:$0xff] }
 0x106   : > { %v384_v54 = vrot.slane %v342_v51, %v383_v43  ;;  %v743_v43 = vld [vmem:[#allocation7 + $0x50] sm:$0xff]  ;;  %v1150_v51 = vpack.c.bf16 %v748_v48, %v746_v47  ;;  %v762_v39 = vld [vmem:[#allocation7 + $0xe8] sm:$0xff]  ;;  %v764_v40 = vld [vmem:[#allocation7 + $0xf8] sm:$0xff] }
 0x107   : > { %v1148_v46 = vpack.c.bf16 %v743_v43, %v741_v41  ;;  %v698_v41 = vld [vmem:[#allocation5 + $0xe8] sm:$0xff]  ;;  %v1164_v43 = vpack.c.bf16 %v759_v35, %v757_v34  ;;  %v1166_v45 = vpack.c.bf16 %v764_v40, %v762_v39  ;;  %v763_v47 = vld [vmem:[#allocation7 + $0xf0] sm:$0xff]  ;;  %v697_v48 = vld [vmem:[#allocation5 + $0xe0] sm:$0xff] }
 0x108   : > { %v386_v56 = vsel %vm385_vm2, %v384_v54, %v379_v55  ;;  %v747_v54 = vld [vmem:[#allocation7 + $0x70] sm:$0xff]  ;;  %v712_v35 = vld [vmem:[#allocation5 + $0x158] sm:$0xff]  ;;  %v709_v40 = vld [vmem:[#allocation5 + $0x140] sm:$0xff] }
 0x109   : > { %v393_v58 = vsel %vm392_vm3, %v391_v52, %v386_v56  ;;  %v684_v52 = vld [vmem:[#allocation5 + $0x78] sm:$0xff]  ;;  %v681_v56 = vld [vmem:[#allocation5 + $0x60] sm:$0xff] }
 0x10a   : > { %v420_v60 = vsel %vm419_vm4, %v393_v58, %v417_v59  ;;  %v1214_v55 = vpack.c.bf16 %v684_v52, %v682_v49  ;;  %v750_v58 = vld [vmem:[#allocation7 + $0x88] sm:$0xff]  ;;  %v752_v59 = vld [vmem:[#allocation7 + $0x98] sm:$0xff] }
 0x10b   : > { %1125 = vmatmul.mubr.msk.f32.vlgmr.msra.gmra.mrb[0].mxu0 %vm432_vm5, %v420_v60  ;;  %v686_v60 = vld [vmem:[#allocation5 + $0x88] sm:$0xff]  ;;  %v768_v52 = vld [vmem:[#allocation7 + $0x118] sm:$0xff] }
 0x10c   : > { %1141 = vmatpush1.bf16.msra.mxu0 %v1140_v19  ;;  %v1218_v12 = vpack.c.bf16 %v688_v61, %v686_v60  ;;  %v1220_v19 = vpack.c.bf16 %v687_v13, %v685_v9  ;;  %v701_v60 = vld [vmem:[#allocation5 + $0x100] sm:$0xff] }
 0x10d   : > { %1143 = vmatprep.subr.bf16.mxu0 %v1142_v27  ;;  %v760_v27 = vld [vmem:[#allocation7 + $0xd8] sm:$0xff] }
 0x110   : > { %1145 = vmatpush1.bf16.msra.mxu0 %v1144_v33  ;;  %v1162_v33 = vpack.c.bf16 %v760_v27, %v758_v26 }
 0x111   : > { %1147 = vmatprep.subr.bf16.mxu0 %v1146_v38  ;;  %v695_v38 = vld [vmem:[#allocation5 + $0xd0] sm:$0xff] }
 0x112   : > { %v1228_v44 = vpack.c.bf16 %v695_v38, %v693_v36  ;;  %v773_v36 = vld [vmem:[#allocation7 + $0x140] sm:$0xff] }
 0x114   : > { %1149 = vmatpush1.bf16.msra.mxu0 %v1148_v46  ;;  %v761_v46 = vld [vmem:[#allocation7 + $0xe0] sm:$0xff] }
 0x115   : > { %1151 = vmatprep.subr.bf16.mxu0 %v1150_v51  ;;  %v766_v51 = vld [vmem:[#allocation7 + $0x108] sm:$0xff] }
 0x1de   : > { %v502_v63 = vpop.f32.mrb[0].mxu0 }
 0x1df   : > { %v503_v3 = vadd.f32 %v1094_v62, %v502_v63  ;;  %v1126_v7 = vpop.f32.mrb[1].mxu0  ;;  %v1152_v62 = vpack.c.bf16 %v747_v54, %v745_v53  ;;  %v1216_v63 = vpack.c.bf16 %v683_v57, %v681_v56  ;;  %v702_v53 = vld [vmem:[#allocation5 + $0x108] sm:$0xff]  ;;  %v704_v54 = vld [vmem:[#allocation5 + $0x118] sm:$0xff]  ;;  %v1170_v57 = vpack.c.bf16 %v768_v52, %v766_v51  ;;  %v713_v52 = vld [vmem:[#allocation5 + $0x160] sm:$0xff] }
 0x1e0   : > { %v749_v7 = vld [vmem:[#allocation7 + $0x80] sm:$0xff]  ;;  %v1234_v61 = vpack.c.bf16 %v704_v54, %v702_v53  ;;  %v715_v53 = vld [vmem:[#allocation5 + $0x170] sm:$0xff]  ;;  %v1818_v54 = vsub.s32 0, %v1802_v29 }
 0x1e1   : > { %v506_v8 = vmax.f32 %v503_v3, 0.0  ;;  %v1154_v3 = vpack.c.bf16 %v752_v59, %v750_v58  ;;  %1153 = vmatpush1.bf16.msra.mxu0 %v1152_v62  ;;  %v765_v58 = vld [vmem:[#allocation7 + $0x100] sm:$0xff]  ;;  %v767_v59 = vld [vmem:[#allocation7 + $0x110] sm:$0xff] }
 0x1e2   : > { %v703_v62 = vld [vmem:[#allocation5 + $0x110] sm:$0xff]  ;;  %v1172_v9 = vpack.c.bf16 %v767_v59, %v765_v58  ;;  %v718_v58 = vld [vmem:[#allocation5 + $0x188] sm:$0xff] }
 0x1e3   : > { %1130 = vmatmul.mubr.msk.f32.vlgmr.msra.gmra.mrb[0].mxu1 %vm515_vm7, %v506_v8  ;;  %v751_v8 = vld [vmem:[#allocation7 + $0x90] sm:$0xff]  ;;  %1155 = vmatprep.subr.bf16.mxu0 %v1154_v3  ;;  %v772_v3 = vld [vmem:[#allocation7 + $0x138] sm:$0xff] }
 0x1e4   : > { %1205 = vmatpush1.bf16.msra.mxu1 %v1204_v23  ;;  %v1156_v18 = vpack.c.bf16 %v751_v8, %v749_v7  ;;  %v689_v23 = vld [vmem:[#allocation5 + $0xa0] sm:$0xff]  ;;  %v706_v7 = vld [vmem:[#allocation5 + $0x128] sm:$0xff]  ;;  %v708_v8 = vld [vmem:[#allocation5 + $0x138] sm:$0xff] }
 0x1e5   : > { %1207 = vmatprep.subr.bf16.mxu1 %v1206_v28  ;;  %v694_v28 = vld [vmem:[#allocation5 + $0xc8] sm:$0xff]  ;;  %v1224_v32 = vpack.c.bf16 %v691_v25, %v689_v23  ;;  %v1238_v14 = vpack.c.bf16 %v708_v8, %v706_v7  ;;  %v769_v23 = vld [vmem:[#allocation7 + $0x120] sm:$0xff] }
 0x1e6   : > { %1157 = vmatpush1.bf16.msra.mxu0 %v1156_v18  ;;  %v705_v25 = vld [vmem:[#allocation5 + $0x120] sm:$0xff] }
 0x1e7   : > { %1159 = vmatprep.subr.bf16.mxu0 %v1158_v20  ;;  %v717_v8 = vld [vmem:[#allocation5 + $0x180] sm:$0xff] }
 0x1e8   : > { %1209 = vmatpush1.bf16.msra.mxu1 %v1208_v37  ;;  %v1226_v37 = vpack.c.bf16 %v696_v30, %v694_v28  ;;  %v707_v28 = vld [vmem:[#allocation5 + $0x130] sm:$0xff] }
 0x1e9   : > { %1211 = vmatprep.subr.bf16.mxu1 %v1210_v42  ;;  %v700_v42 = vld [vmem:[#allocation5 + $0xf8] sm:$0xff]  ;;  %v1240_v30 = vpack.c.bf16 %v707_v28, %v705_v25  ;;  %v790_v25 = vld [vmem:[#allocation7 + $0x1c8] sm:$0xff] }
 0x1ea   : > { %1161 = vmatpush1.bf16.msra.mxu0 %v1160_v31  ;;  %v1230_v49 = vpack.c.bf16 %v700_v42, %v698_v41  ;;  %v774_v31 = vld [vmem:[#allocation7 + $0x148] sm:$0xff]  ;;  %v711_v41 = vld [vmem:[#allocation5 + $0x150] sm:$0xff] }
 0x1eb   : > { %1163 = vmatprep.subr.bf16.mxu0 %v1162_v33  ;;  %v710_v33 = vld [vmem:[#allocation5 + $0x148] sm:$0xff]  ;;  %v1244_v42 = vpack.c.bf16 %v711_v41, %v709_v40  ;;  %v732_v41 = vld [vmem:[#allocation5 + $0x1f8] sm:$0xff] }
 0x1ec   : > { %1213 = vmatpush1.bf16.msra.mxu1 %v1212_v50  ;;  %v699_v50 = vld [vmem:[#allocation5 + $0xf0] sm:$0xff]  ;;  %v1242_v38 = vpack.c.bf16 %v712_v35, %v710_v33  ;;  %v725_v35 = vld [vmem:[#allocation5 + $0x1c0] sm:$0xff]  ;;  %v730_v40 = vld [vmem:[#allocation5 + $0x1e8] sm:$0xff] }
 0x1ed   : > { %1215 = vmatprep.subr.bf16.mxu1 %v1214_v55  ;;  %v1168_v55 = vpack.c.bf16 %v763_v47, %v761_v46  ;;  %v1232_v56 = vpack.c.bf16 %v699_v50, %v697_v48  ;;  %v716_v47 = vld [vmem:[#allocation5 + $0x178] sm:$0xff]  ;;  %v777_v48 = vld [vmem:[#allocation7 + $0x160] sm:$0xff] }
 0x1ee   : > { %1165 = vmatpush1.bf16.msra.mxu0 %v1164_v43  ;;  %v778_v43 = vld [vmem:[#allocation7 + $0x168] sm:$0xff] }
 0x1ef   : > { %1167 = vmatprep.subr.bf16.mxu0 %v1166_v45  ;;  %v714_v45 = vld [vmem:[#allocation5 + $0x168] sm:$0xff] }
 0x1f0   : > { %1217 = vmatpush1.bf16.msra.mxu1 %v1216_v63  ;;  %v770_v63 = vld [vmem:[#allocation7 + $0x128] sm:$0xff]  ;;  %v1246_v50 = vpack.c.bf16 %v716_v47, %v714_v45  ;;  %v795_v45 = vld [vmem:[#allocation7 + $0x1f0] sm:$0xff] }
 0x1f1   : > { %1219 = vmatprep.subr.bf16.mxu1 %v1218_v12  ;;  %v1236_v12 = vpack.c.bf16 %v703_v62, %v701_v60  ;;  %v1174_v13 = vpack.c.bf16 %v772_v3, %v770_v63  ;;  %v720_v60 = vld [vmem:[#allocation5 + $0x198] sm:$0xff]  ;;  %v783_v62 = vld [vmem:[#allocation7 + $0x190] sm:$0xff] }
 0x1f2   : > { %1169 = vmatpush1.bf16.msra.mxu0 %v1168_v55  ;;  %v1248_v55 = vpack.c.bf16 %v715_v53, %v713_v52  ;;  %v1250_v3 = vpack.c.bf16 %v720_v60, %v718_v58 }
 0x1f3   : > { %1171 = vmatprep.subr.bf16.mxu0 %v1170_v57  ;;  %v784_v57 = vld [vmem:[#allocation7 + $0x198] sm:$0xff] }
 0x1f4   : > { %1221 = vmatpush1.bf16.msra.mxu1 %v1220_v19 }
 0x1f5   : > { %1223 = vmatprep.subr.bf16.mxu1 %v1222_v24  ;;  %v771_v24 = vld [vmem:[#allocation7 + $0x130] sm:$0xff] }
 0x1f6   : > { %1173 = vmatpush1.bf16.msra.mxu0 %v1172_v9  ;;  %v1176_v27 = vpack.c.bf16 %v771_v24, %v769_v23  ;;  %v719_v9 = vld [vmem:[#allocation5 + $0x190] sm:$0xff] }
 0x1f7   : > { %1175 = vmatprep.subr.bf16.mxu0 %v1174_v13  ;;  %v786_v13 = vld [vmem:[#allocation7 + $0x1a8] sm:$0xff]  ;;  %v723_v23 = vld [vmem:[#allocation5 + $0x1b0] sm:$0xff] }
 0x1f8   : > { %1225 = vmatpush1.bf16.msra.mxu1 %v1224_v32  ;;  %v776_v32 = vld [vmem:[#allocation7 + $0x158] sm:$0xff] }
 0x1f9   : > { %1227 = vmatprep.subr.bf16.mxu1 %v1226_v37  ;;  %v1178_v34 = vpack.c.bf16 %v776_v32, %v774_v31  ;;  %v775_v37 = vld [vmem:[#allocation7 + $0x150] sm:$0xff]  ;;  %v789_v31 = vld [vmem:[#allocation7 + $0x1c0] sm:$0xff] }
 0x1fa   : > { %1177 = vmatpush1.bf16.msra.mxu0 %v1176_v27  ;;  %v1180_v39 = vpack.c.bf16 %v775_v37, %v773_v36  ;;  %v726_v27 = vld [vmem:[#allocation5 + $0x1c8] sm:$0xff]  ;;  %v791_v32 = vld [vmem:[#allocation7 + $0x1d0] sm:$0xff] }
 0x1fb   : > { %1179 = vmatprep.subr.bf16.mxu0 %v1178_v34  ;;  %v1196_v34 = vpack.c.bf16 %v791_v32, %v789_v31  ;;  %v727_v36 = vld [vmem:[#allocation5 + $0x1d0] sm:$0xff]  ;;  %v794_v37 = vld [vmem:[#allocation7 + $0x1e8] sm:$0xff] }
 0x1fc   : > { %1229 = vmatpush1.bf16.msra.mxu1 %v1228_v44  ;;  %v780_v44 = vld [vmem:[#allocation7 + $0x178] sm:$0xff] }
 0x1fd   : > { %1231 = vmatprep.subr.bf16.mxu1 %v1230_v49  ;;  %v1182_v46 = vpack.c.bf16 %v780_v44, %v778_v43  ;;  %v779_v49 = vld [vmem:[#allocation7 + $0x170] sm:$0xff]  ;;  %v1262_v43 = vpack.c.bf16 %v732_v41, %v730_v40  ;;  %v793_v44 = vld [vmem:[#allocation7 + $0x1e0] sm:$0xff] }
 0x1fe   : > { %1181 = vmatpush1.bf16.msra.mxu0 %v1180_v39  ;;  %v1184_v51 = vpack.c.bf16 %v779_v49, %v777_v48  ;;  %v796_v39 = vld [vmem:[#allocation7 + $0x1f8] sm:$0xff]  ;;  %v1200_v47 = vpack.c.bf16 %v795_v45, %v793_v44  ;;  %v731_v48 = vld [vmem:[#allocation5 + $0x1f0] sm:$0xff] }
 0x1ff   : > { %1183 = vmatprep.subr.bf16.mxu0 %v1182_v46  ;;  %v729_v46 = vld [vmem:[#allocation5 + $0x1e0] sm:$0xff] }
 0x200   : > { %1233 = vmatpush1.bf16.msra.mxu1 %v1232_v56  ;;  %v782_v56 = vld [vmem:[#allocation7 + $0x188] sm:$0xff]  ;;  %v1264_v49 = vpack.c.bf16 %v731_v48, %v729_v46 }
 0x201   : > { %1235 = vmatprep.subr.bf16.mxu1 %v1234_v61  ;;  %v1186_v59 = vpack.c.bf16 %v784_v57, %v782_v56  ;;  %v781_v61 = vld [vmem:[#allocation7 + $0x180] sm:$0xff] }
 0x202   : > { %1185 = vmatpush1.bf16.msra.mxu0 %v1184_v51  ;;  %v1188_v7 = vpack.c.bf16 %v783_v62, %v781_v61 }
 0x203   : > { %1187 = vmatprep.subr.bf16.mxu0 %v1186_v59 }
 0x204   : > { %1237 = vmatpush1.bf16.msra.mxu1 %v1236_v12  ;;  %v1252_v12 = vpack.c.bf16 %v719_v9, %v717_v8 }
 0x205   : > { %1239 = vmatprep.subr.bf16.mxu1 %v1238_v14  ;;  %v788_v14 = vld [vmem:[#allocation7 + $0x1b8] sm:$0xff] }
 0x206   : > { %1189 = vmatpush1.bf16.msra.mxu0 %v1188_v7 }
 0x208   : > { %1241 = vmatpush1.bf16.msra.mxu1 %v1240_v30  ;;  %v728_v30 = vld [vmem:[#allocation5 + $0x1d8] sm:$0xff] }
 0x209   : > { %1243 = vmatprep.subr.bf16.mxu1 %v1242_v38  ;;  %v1258_v33 = vpack.c.bf16 %v728_v30, %v726_v27  ;;  %v1260_v38 = vpack.c.bf16 %v727_v36, %v725_v35 }
 0x20c   : > { %1245 = vmatpush1.bf16.msra.mxu1 %v1244_v42  ;;  %v1198_v42 = vpack.c.bf16 %v796_v39, %v794_v37 }
 0x20d   : > { %1247 = vmatprep.subr.bf16.mxu1 %v1246_v50 }
 0x210   : > { %1249 = vmatpush1.bf16.msra.mxu1 %v1248_v55 }
 0x211   : > { %1251 = vmatprep.subr.bf16.mxu1 %v1250_v3 }
 0x214   : > { %1253 = vmatpush1.bf16.msra.mxu1 %v1252_v12 }
 0x2b6   : > { %v589_v16 = vpop.f32.mrb[0].mxu1 }
 0x2b7   : > { %v590_v17 = vadd.f32 %v1096_v15, %v589_v16  ;;  %v1131_v18 = vpop.f32.mrb[1].mxu1  ;;  %v722_v15 = vld [vmem:[#allocation5 + $0x1a8] sm:$0xff]  ;;  %v1190_v16 = vpack.c.bf16 %v788_v14, %v786_v13 }
 0x2b8   : > { %v785_v18 = vld [vmem:[#allocation7 + $0x1a0] sm:$0xff] }
 0x2b9   : > { %v594_v19 = vrot.slane %v590_v17, 1  ;;  %1191 = vmatprep.subr.bf16.mxu0 %v1190_v16 }
 0x2bb   : > { %v596_v20 = vadd.f32 %v594_v19, %v590_v17  ;;  %v724_v17 = vld [vmem:[#allocation5 + $0x1b8] sm:$0xff]  ;;  %v787_v19 = vld [vmem:[#allocation7 + $0x1b0] sm:$0xff] }
 0x2bd   : > { %v1099_v21 = vmul.f32 -1.442695, %v596_v20  ;;  %v1254_v20 = vpack.c.bf16 %v724_v17, %v722_v15 }
 0x2bf   : > { %1342 = vpow2.f32 %v1099_v21  ;;  %v1192_v21 = vpack.c.bf16 %v787_v19, %v785_v18  ;;  %1255 = vmatprep.subr.bf16.mxu1 %v1254_v20 }
 0x2c1   : > { %1193 = vmatpush1.bf16.msra.mxu0 %v1192_v21 }
 0x2c9   : > { %v1343_v22 = vpop.eup %1342 }
 0x2ca   : > { %v600_v26 = vadd.f32 1.0, %v1343_v22  ;;  %v721_v22 = vld [vmem:[#allocation5 + $0x1a0] sm:$0xff] }
 0x2cb   : > { %v1256_v24 = vpack.c.bf16 %v723_v23, %v721_v22 }
 0x2cc   : > { %1344 = vrcp.f32 %v600_v26  ;;  %v792_v26 = vld [vmem:[#allocation7 + $0x1d8] sm:$0xff] }
 0x2cd   : > { %v1194_v28 = vpack.c.bf16 %v792_v26, %v790_v25  ;;  %1257 = vmatpush1.bf16.msra.mxu1 %v1256_v24 }
 0x2ce   : > { %1259 = vmatprep.subr.bf16.mxu1 %v1258_v33 }
 0x2cf   : > { %1195 = vmatprep.subr.bf16.mxu0 %v1194_v28 }
 0x2d0   : > { %1197 = vmatpush1.bf16.msra.mxu0 %v1196_v34 }
 0x2d1   : > { %1261 = vmatpush1.bf16.msra.mxu1 %v1260_v38  ;;  %1199 = vmatprep.subr.bf16.mxu0 %v1198_v42 }
 0x2d2   : > { %1263 = vmatprep.subr.bf16.mxu1 %v1262_v43 }
 0x2d4   : > { %1201 = vmatpush1.bf16.msra.mxu0 %v1200_v47 }
 0x2d5   : > { %1265 = vmatpush1.bf16.msra.mxu1 %v1264_v49 }
 0x2d6   : > { %v1345_v63 = vpop.eup %1344 }
 0x2d7   : > { %v606_v29 = vrot.slane %v1345_v63, %v1818_v54 }
 0x2d9   : > { %612 = vbcast.lane.b32.xlu1 %v606_v29, 264  ;;  %608 = vbcast.lane.b32.xlu0 %v606_v29, 256 }
 0x2dd   : > { %616 = vbcast.lane.b32.xlu1 %v606_v29, 272 }
 0x2e1   : > { %620 = vbcast.lane.b32.xlu1 %v606_v29, 280 }
 0x34b   : > { %v613_v50 = vpop.permute.xlu1 %612  ;;  %v609_v51 = vpop.permute.xlu0 %608 }
 0x34c   : > { %v1822_v52 = vmul.f32 %v613_v50, %v1768_v5  ;;  %v1825_v53 = vmul.f32 %v613_v50, %v1770_v6  ;;  %v1828_v55 = vmul.f32 %v609_v51, %v1762_v2  ;;  %v1831_v56 = vmul.f32 %v609_v51, %v1766_v4 }
 0x34e   : > { %v648_v5 = vadd.f32 %v1822_v52, %v1828_v55  ;;  %v657_v6 = vadd.f32 %v1825_v53, %v1831_v56 }
 0x34f   : > { %v617_v57 = vpop.permute.xlu1 %616 }
 0x350   : > { %v1834_v58 = vmul.f32 %v617_v57, %v1758_v0  ;;  %v1837_v59 = vmul.f32 %v617_v57, %v1760_v1 }
 0x352   : > { %v649_v2 = vadd.f32 %v648_v5, %v1834_v58  ;;  %v658_v61 = vadd.f32 %v657_v6, %v1837_v59  ;;  %v630_v1 = vmax.f32 %v1828_v55, %v1834_v58  ;;  %v639_v62 = vmax.f32 %v1831_v56, %v1837_v59 }
 0x353   : > { %v621_v60 = vpop.permute.xlu1 %620 }
 0x354   : > { %v1846_v4 = vmul.f32 %v621_v60, %v1778_v10  ;;  %v1849_v0 = vmul.f32 %v621_v60, %v1780_v11 }
 0x356   : > { %v631_v63 = vmax.f32 %v1822_v52, %v1846_v4  ;;  %v640_v3 = vmax.f32 %v1825_v53, %v1849_v0  ;;  %v650_v7 = vadd.f32 %v649_v2, %v1846_v4  ;;  %v659_v10 = vadd.f32 %v658_v61, %v1849_v0 }
 0x358   : > { %v632_v8 = vmax.f32 %v630_v1, %v631_v63  ;;  %v641_v9 = vmax.f32 %v639_v62, %v640_v3  ;;  %v651_v11 = vrot.slane %v650_v7, 4  ;;  %v660_v29 = vrot.slane %v659_v10, 4 }
 0x35a   : > { %v633_v12 = vrot.slane %v632_v8, 4  ;;  %v642_v13 = vrot.slane %v641_v9, 4  ;;  %v652_v14 = vadd.f32 %v651_v11, %v650_v7  ;;  %v661_v15 = vadd.f32 %v660_v29, %v659_v10 }
 0x35c   : > { %v634_v16 = vmax.f32 %v632_v8, %v633_v12  ;;  %v653_v17 = vrot.slane %v652_v14, 2  ;;  %v662_v18 = vrot.slane %v661_v15, 2  ;;  %v643_v19 = vmax.f32 %v641_v9, %v642_v13 }
 0x35e   : > { %v635_v20 = vrot.slane %v634_v16, 2  ;;  %v654_v21 = vadd.f32 %v653_v17, %v652_v14  ;;  %v663_v22 = vadd.f32 %v662_v18, %v661_v15  ;;  %v644_v23 = vrot.slane %v643_v19, 2 }
 0x360   : > { %v664_v24 = vrot.slane %v663_v22, 1  ;;  %v645_v25 = vmax.f32 %v643_v19, %v644_v23  ;;  %v655_v26 = vrot.slane %v654_v21, 1  ;;  %v636_v27 = vmax.f32 %v634_v16, %v635_v20 }
 0x362   : > { %v665_v28 = vadd.f32 %v664_v24, %v663_v22  ;;  %v646_v30 = vrot.slane %v645_v25, 1  ;;  %v656_v31 = vadd.f32 %v655_v26, %v654_v21  ;;  %v637_v32 = vrot.slane %v636_v27, 1 }
 0x364   : > { %v668_v33 = vmul.f32 0.03125, %v665_v28  ;;  %v647_v34 = vmax.f32 %v645_v25, %v646_v30  ;;  %v667_v35 = vmul.f32 0.03125, %v656_v31  ;;  %v638_v36 = vmax.f32 %v636_v27, %v637_v32 }
 0x366   : > { %861 = vmatprep.mubr.f32.mxu0 %v668_v33  ;;  %932 = vmatprep.mubr.f32.mxu1 %v647_v34 }
 0x367   : > { %862 = vmatmul.mubr.f32.vlgmr.msra.gmra.mrb[2].mxu0 %v667_v35  ;;  %933 = vmatmul.mubr.f32.vlgmr.msra.gmra.mrb[2].mxu1 %v638_v36 }
 0x43a   : > { %v863_v37 = vpop.f32.mrb[2].mxu0  ;;  %v934_v38 = vpop.f32.mrb[2].mxu1 }
 0x43b   : > { %v935_v39 = vadd.f32 %v934_v38, %v863_v37  ;;  %v865_v40 = vpop.f32.mrb[3].mxu0  ;;  %v936_v41 = vpop.f32.mrb[3].mxu1 }
 0x43c   : > { %v937_v42 = vadd.f32 %v936_v41, %v865_v40 }
 0x43d   : > { %v1100_v43 = vmul.f32 -1.442695, %v935_v39 }
 0x43e   : > { %v1101_v44 = vmul.f32 -1.442695, %v937_v42 }
 0x43f   : > { %1346 = vpow2.f32 %v1100_v43 }
 0x440   : > { %1348 = vpow2.f32 %v1101_v44 }
 0x449   : > { %v1347_v45 = vpop.eup %1346 }
 0x44a   : > { %v1349_v46 = vpop.eup %1348  ;;  %v945_v47 = vadd.f32 1.0, %v1347_v45 }
 0x44b   : > { %v946_v48 = vadd.f32 1.0, %v1349_v46 }
 0x44c   : > { %1350 = vrcp.f32 %v945_v47 }
 0x44d   : > { %1352 = vrcp.f32 %v946_v48 }
 0x456   : > { %v1351_v49 = vpop.eup %1350 }
 0x457   : > { %v1353_v50 = vpop.eup %1352  ;;  %v954_v51 = vrot.slane %v1351_v49, %v1818_v54 }
 0x458   : > { %v958_v57 = vrot.slane %v1353_v50, %v1818_v54 }
 0x459   : > { %v959_v5 = vmul.f32 %v954_v51, %v1828_v55  ;;  %v961_v6 = vmul.f32 %v954_v51, %v1822_v52  ;;  %v963_v60 = vmul.f32 %v954_v51, %v1834_v58  ;;  %v965_v2 = vmul.f32 %v954_v51, %v1846_v4 }
 0x45a   : > { %v960_v54 = vmul.f32 %v958_v57, %v1831_v56  ;;  %v962_v55 = vmul.f32 %v958_v57, %v1825_v53  ;;  %v964_v52 = vmul.f32 %v958_v57, %v1837_v59  ;;  %v966_v58 = vmul.f32 %v958_v57, %v1849_v0 }
 0x45b   : > { %967 = vst [vmem:[%s325_s11] sm:$0xff] %v959_v5  ;;  %969 = vst [vmem:[%s325_s11 + $0x10] sm:$0xff] %v961_v6 }
 0x45c   : > { %971 = vst [vmem:[%s325_s11 + $0x20] sm:$0xff] %v963_v60  ;;  %973 = vst [vmem:[%s325_s11 + $0x30] sm:$0xff] %v965_v2 }
 0x45d   : > { %968 = vst [vmem:[%s325_s11 + $0x8] sm:$0xff] %v960_v54  ;;  %970 = vst [vmem:[%s325_s11 + $0x18] sm:$0xff] %v962_v55 }
 0x45e   : > { %972 = vst [vmem:[%s325_s11 + $0x28] sm:$0xff] %v964_v52  ;;  %974 = vst [vmem:[%s325_s11 + $0x38] sm:$0xff] %v966_v58 }
 0x45f   : > { %1453 = shalt.err (!%p1450_p1)
}
 0x460   : > { %s1454_s13 = scalar_lea.hbm %s1873_s28, 1024  ;;  %s1458_s29 = scalar_lea.hbm %s1930_s7, 2048 }
 0x461   : > { %p1455_p13 = scmp.ne.s32.totalorder %s1873_s28, %s1454_s13  ;;  %p1459_p4 = scmp.lt.u32.totalorder %s1873_s28, %s1930_s7 }
 0x462   : > { %p1460_p5 = scmp.lt.u32.totalorder %s1458_s29, %s1454_s13  ;;  %p1462_p11 = scmp.lt.u32.totalorder %s1454_s13, %s1873_s28 }
 0x463   : > { %p1456_p6 = pnand %p1455_p13, %p1946_p0 }
 0x464   : > { %p1461_p8 = por %p1460_p5, %p1459_p4 }
 0x465   : > { %p1457_p10 = pneg %p1456_p6 }
 0x466   : > { %p1463_p2 = por %p1462_p11, %p1461_p8 }
 0x468   : > { %p1464_p3 = pnand %p1463_p2, %p1457_p10 }
 0x46a   : > { %1467 = shalt.err (!%p1464_p3)
}
 0x46b   : > { %s1521_s19 = smov 256   ;;  %s1522_s14 = smov 16  }
 0x46c   : > { %1278 = dma.vmem_to_hbm [thread:$0]  (%p1946_p0), %s1875_s10, 1024, %s1873_s28, %s976_s22, %s1521_s19, %s1521_s19, %s1522_s14  }
 0x46d PF: > { %s1004_s21 = sand.u32 1, %s1498_s24   ;;  %p1947_p7 = scmp.ne.s32.totalorder %s1936_s8, 0 }
 0x46e   : > { %p1948_p9 = scmp.ge.s32.totalorder %s1510_s27, 2  ;;  %s1005_s23 = scalar_lea.sflag [#allocation4], %s1004_s21 }
 0x470   : > { %p1292_p12 = pnand %p1948_p9, %p1947_p7 }
 0x472   : > { %1493 = dma.done.wait (!%p1292_p12), %s1005_s23, 1024  }
 0x473   : > { %1495 = vsyncadd (!%p1292_p12), %s1005_s23, 4294966272  ;;  %p21_p1 = scmp.ge.s32.totalorder %s1679_s12, 4   ;;  %s1949_s24 = smov %s1502_s25 }
 0x474   : > { %s1950_s25 = smov %s1506_s26  ;;  %s1951_s26 = smov %s1695_s17 }
 0x475   : > { %s1952_s27 = smov %s1679_s12  ;;  %23 = sbr.rel (!%p21_p1) target bundleno = 6 (0x6), region = 101 }
 0x47c   :  { %1010 = vsyncpa [#allocation3], 1 }
 0x47d   :  { %1012 = vsyncpa [#allocation3 + $0x1], 1 }
 0x47e   :  { %1013 = vsyncpa [#allocation6], 1 }
 0x47f   :  { %1014 = vsyncpa [#allocation4], 1 }
 0x480   :  { %1016 = vsyncpa [#allocation4 + $0x1], 1 }

</bundles_post_ra>
